<compile_context>
chip_gen: v5e
topology: v5e:2x2
jax: 0.10.0
libtpu: 0.0.40
codegen_flags: <defaults>
</compile_context>

<pallas_src>
import jax
import jax.numpy as jnp
from jax.experimental import pallas as pl
from jax.experimental.pallas import tpu as pltpu


def _make_kernel(dim: int, hidden: int):
    def kernel(x1_ref, x2_ref, w1_ref, b1_ref, w2_ref, b2_ref, o_ref):
        # x1_ref, x2_ref: (dim, tpr, 128) pixel tiles (native dtype).
        # w1_ref: (2*dim, hidden) SMEM f32, b1_ref: (hidden,) SMEM f32,
        # w2_ref: (hidden, 2) SMEM f32,  b2_ref: (2,) SMEM f32.
        # o_ref: (2, tpr, 128).
        y0 = None
        y1 = None
        for j in range(hidden):
            acc = None
            for c in range(dim):
                t = (w1_ref[c, j] * x1_ref[c].astype(jnp.float32)
                     + w1_ref[dim + c, j] * x2_ref[c].astype(jnp.float32))
                acc = t if acc is None else acc + t
            h = jnp.maximum(acc + b1_ref[j], 0.0)          # ReLU
            p0 = w2_ref[j, 0] * h
            p1 = w2_ref[j, 1] * h
            y0 = p0 if y0 is None else y0 + p0
            y1 = p1 if y1 is None else y1 + p1
        o_ref[0, :, :] = jax.nn.sigmoid(y0 + b2_ref[0]).astype(o_ref.dtype)
        o_ref[1, :, :] = jax.nn.sigmoid(y1 + b2_ref[1]).astype(o_ref.dtype)

    return kernel


def _choose_tiling(n_px: int, max_rows: int = 64):
    """Pick (padded pixel count, tile rows) viewing pixels as (rows, 128)."""
    p_pad = ((n_px + 127) // 128) * 128
    rows = p_pad // 128
    if rows <= max_rows:
        return p_pad, rows                      # whole pixel axis in one block
    best = 0
    for t in range(8, max_rows + 1, 8):         # multiple-of-8 divisor of rows
        if rows % t == 0:
            best = t
    if best:
        return p_pad, best
    rows = ((rows + 7) // 8) * 8                # pad so an 8-row tile divides
    return rows * 128, 8


def spatial_weights_forward(x1, x2, w1, b1, w2, b2, *, max_tile_rows=64):
    """x1, x2: (B, dim, H, W) NCHW (native dtype; upcast happens in-kernel).

    w1: (2*dim, hidden)  == conv1.weight[:, :, 0, 0].T
    b1: (hidden,)
    w2: (hidden, 2)      == conv2.weight[:, :, 0, 0].T
    b2: (2,)
    Returns (2, B, 1, H, W), matching the PyTorch module.
    """
    B, dim, H, W = x1.shape
    hidden = w1.shape[1]
    P = H * W
    p_pad, tpr = _choose_tiling(P, max_tile_rows)
    pr = p_pad // 128

    x1r = x1.reshape(B, dim, P)                 # free view of NCHW storage
    x2r = x2.reshape(B, dim, P)
    if p_pad != P:
        # TODO(synk): rare path (H*W not a multiple of 128) costs one pad pass.
        x1r = jnp.pad(x1r, ((0, 0), (0, 0), (0, p_pad - P)))
        x2r = jnp.pad(x2r, ((0, 0), (0, 0), (0, p_pad - P)))
    x1r = x1r.reshape(B, dim, pr, 128)
    x2r = x2r.reshape(B, dim, pr, 128)

    out_dtype = jnp.result_type(x1.dtype, w1.dtype)
    smem_spec = pl.BlockSpec(memory_space=pltpu.MemorySpace.SMEM)

    n_px = B * p_pad
    cost = pl.CostEstimate(
        flops=2 * n_px * (2 * dim * hidden + 2 * hidden),
        transcendentals=2 * n_px,
        bytes_accessed=n_px * (2 * dim * jnp.dtype(x1.dtype).itemsize
                               + 2 * jnp.dtype(out_dtype).itemsize),
    )

    out = pl.pallas_call(
        _make_kernel(dim, hidden),
        out_shape=jax.ShapeDtypeStruct((2, B, pr, 128), out_dtype),
        grid=(B, pr // tpr),
        in_specs=[
            pl.BlockSpec((None, dim, tpr, 128), lambda b, p: (b, 0, p, 0)),
            pl.BlockSpec((None, dim, tpr, 128), lambda b, p: (b, 0, p, 0)),
            smem_spec,   # w1
            smem_spec,   # b1
            smem_spec,   # w2
            smem_spec,   # b2
        ],
        out_specs=pl.BlockSpec((2, None, tpr, 128), lambda b, p: (0, b, p, 0)),
        compiler_params=pltpu.CompilerParams(
            dimension_semantics=("parallel", "parallel"),
        ),
        cost_estimate=cost,
    )(
        x1r,
        x2r,
        w1.astype(jnp.float32),
        b1.astype(jnp.float32),
        w2.astype(jnp.float32),
        b2.astype(jnp.float32),
    )

    out = out.reshape(2, B, p_pad)
    if p_pad != P:
        out = out[:, :, :P]
    return out.reshape(2, B, 1, H, W)           # free reshape, no transpose


def _reference_forward(x1, x2, w1, b1, w2, b2):
    """Pure-JAX reference matching PyTorch exactly (for sanity check)."""
    B, dim, H, W = x1.shape
    x = jnp.concatenate([x1, x2], axis=1)                        # (B, 2*dim, H, W)
    x = jnp.transpose(x, (0, 2, 3, 1)).astype(jnp.float32)       # (B, H, W, 2*dim)
    h = jnp.maximum(jnp.einsum("bhwc,cd->bhwd", x, w1) + b1, 0.0)
    y = jax.nn.sigmoid(jnp.einsum("bhwd,de->bhwe", h, w2) + b2)  # (B, H, W, 2)
    y = jnp.transpose(y, (0, 3, 1, 2))                           # (B, 2, H, W)
    return jnp.transpose(y.reshape(B, 2, 1, H, W), (1, 0, 2, 3, 4))


if __name__ == "__main__":
    # Small shapes consistent with the module: dim=4, reduction=1.
    B, dim, H, W = 2, 4, 16, 16
    reduction = 1
    hidden = dim // reduction
    cin = 2 * dim

    key = jax.random.PRNGKey(0)
    k1, k2, k3, k4, k5, k6 = jax.random.split(key, 6)

    x1 = jax.random.normal(k1, (B, dim, H, W), dtype=jnp.float32)
    x2 = jax.random.normal(k2, (B, dim, H, W), dtype=jnp.float32)

    # Parameters: nn.Conv2d 1x1 weights squeezed and transposed to (in, out).
    w1 = jax.random.normal(k3, (cin, hidden), dtype=jnp.float32) * 0.1
    b1 = jax.random.normal(k4, (hidden,), dtype=jnp.float32) * 0.1
    w2 = jax.random.normal(k5, (hidden, 2), dtype=jnp.float32) * 0.1
    b2 = jax.random.normal(k6, (2,), dtype=jnp.float32) * 0.1

    out = spatial_weights_forward(x1, x2, w1, b1, w2, b2)
    out = jax.block_until_ready(out)

    ref = jax.block_until_ready(_reference_forward(x1, x2, w1, b1, w2, b2))

    assert out.shape == (2, B, 1, H, W), out.shape
    assert jnp.allclose(out, ref, atol=1e-5, rtol=1e-5), "mismatch vs reference"

    print("KERNEL_OK")
</pallas_src>

<mosaic_0001>
module attributes {stable_mosaic.version = 11 : i64} {
  func.func @kernel(%arg0: i32, %arg1: i32, %arg2: memref<1x4x2x128xf32, #tpu.memory_space<vmem>>, %arg3: memref<1x4x2x128xf32, #tpu.memory_space<vmem>>, %arg4: memref<8x4xf32, #tpu.memory_space<smem>>, %arg5: memref<4xf32, #tpu.memory_space<smem>>, %arg6: memref<4x2xf32, #tpu.memory_space<smem>>, %arg7: memref<2xf32, #tpu.memory_space<smem>>, %arg8: memref<2x1x2x128xf32, #tpu.memory_space<vmem>>) attributes {dimension_semantics = [#tpu.dimension_semantics<parallel>, #tpu.dimension_semantics<parallel>], iteration_bounds = array<i64: 2, 1>, scalar_prefetch = 0 : i64, scratch_operands = 0 : i64, tpu.core_type = #tpu.core_type<tc>, window_params = [{transform_indices = @transform_0, window_bounds = array<i64: 1, 4, 2, 128>}, {transform_indices = @transform_1, window_bounds = array<i64: 1, 4, 2, 128>}, {transform_indices = @transform_2, window_bounds = array<i64: 8, 4>}, {transform_indices = @transform_3, window_bounds = array<i64: 4>}, {transform_indices = @transform_4, window_bounds = array<i64: 4, 2>}, {transform_indices = @transform_5, window_bounds = array<i64: 2>}, {transform_indices = @transform_6, window_bounds = array<i64: 2, 1, 2, 128>}]} {
    %c0 = arith.constant 0 : index
    %c0_0 = arith.constant 0 : index
    %0 = memref.load %arg4[%c0, %c0_0] : memref<8x4xf32, #tpu.memory_space<smem>>
    %c0_1 = arith.constant 0 : index
    %c0_2 = arith.constant 0 : index
    %c0_3 = arith.constant 0 : index
    %c0_4 = arith.constant 0 : index
    %1 = vector.load %arg2[%c0_1, %c0_2, %c0_3, %c0_4] : memref<1x4x2x128xf32, #tpu.memory_space<vmem>>, vector<1x1x2x128xf32>
    %2 = vector.shape_cast %1 : vector<1x1x2x128xf32> to vector<2x128xf32>
    %3 = vector.broadcast %0 : f32 to vector<2x128xf32>
    %4 = arith.mulf %3, %2 : vector<2x128xf32>
    %c4 = arith.constant 4 : index
    %c0_5 = arith.constant 0 : index
    %5 = memref.load %arg4[%c4, %c0_5] : memref<8x4xf32, #tpu.memory_space<smem>>
    %c0_6 = arith.constant 0 : index
    %c0_7 = arith.constant 0 : index
    %c0_8 = arith.constant 0 : index
    %c0_9 = arith.constant 0 : index
    %6 = vector.load %arg3[%c0_6, %c0_7, %c0_8, %c0_9] : memref<1x4x2x128xf32, #tpu.memory_space<vmem>>, vector<1x1x2x128xf32>
    %7 = vector.shape_cast %6 : vector<1x1x2x128xf32> to vector<2x128xf32>
    %8 = vector.broadcast %5 : f32 to vector<2x128xf32>
    %9 = arith.mulf %8, %7 : vector<2x128xf32>
    %10 = arith.addf %4, %9 : vector<2x128xf32>
    %c1 = arith.constant 1 : index
    %c0_10 = arith.constant 0 : index
    %11 = memref.load %arg4[%c1, %c0_10] : memref<8x4xf32, #tpu.memory_space<smem>>
    %c0_11 = arith.constant 0 : index
    %c1_12 = arith.constant 1 : index
    %c0_13 = arith.constant 0 : index
    %c0_14 = arith.constant 0 : index
    %12 = vector.load %arg2[%c0_11, %c1_12, %c0_13, %c0_14] : memref<1x4x2x128xf32, #tpu.memory_space<vmem>>, vector<1x1x2x128xf32>
    %13 = vector.shape_cast %12 : vector<1x1x2x128xf32> to vector<2x128xf32>
    %14 = vector.broadcast %11 : f32 to vector<2x128xf32>
    %15 = arith.mulf %14, %13 : vector<2x128xf32>
    %c5 = arith.constant 5 : index
    %c0_15 = arith.constant 0 : index
    %16 = memref.load %arg4[%c5, %c0_15] : memref<8x4xf32, #tpu.memory_space<smem>>
    %c0_16 = arith.constant 0 : index
    %c1_17 = arith.constant 1 : index
    %c0_18 = arith.constant 0 : index
    %c0_19 = arith.constant 0 : index
    %17 = vector.load %arg3[%c0_16, %c1_17, %c0_18, %c0_19] : memref<1x4x2x128xf32, #tpu.memory_space<vmem>>, vector<1x1x2x128xf32>
    %18 = vector.shape_cast %17 : vector<1x1x2x128xf32> to vector<2x128xf32>
    %19 = vector.broadcast %16 : f32 to vector<2x128xf32>
    %20 = arith.mulf %19, %18 : vector<2x128xf32>
    %21 = arith.addf %15, %20 : vector<2x128xf32>
    %22 = arith.addf %10, %21 : vector<2x128xf32>
    %c2 = arith.constant 2 : index
    %c0_20 = arith.constant 0 : index
    %23 = memref.load %arg4[%c2, %c0_20] : memref<8x4xf32, #tpu.memory_space<smem>>
    %c0_21 = arith.constant 0 : index
    %c2_22 = arith.constant 2 : index
    %c0_23 = arith.constant 0 : index
    %c0_24 = arith.constant 0 : index
    %24 = vector.load %arg2[%c0_21, %c2_22, %c0_23, %c0_24] : memref<1x4x2x128xf32, #tpu.memory_space<vmem>>, vector<1x1x2x128xf32>
    %25 = vector.shape_cast %24 : vector<1x1x2x128xf32> to vector<2x128xf32>
    %26 = vector.broadcast %23 : f32 to vector<2x128xf32>
    %27 = arith.mulf %26, %25 : vector<2x128xf32>
    %c6 = arith.constant 6 : index
    %c0_25 = arith.constant 0 : index
    %28 = memref.load %arg4[%c6, %c0_25] : memref<8x4xf32, #tpu.memory_space<smem>>
    %c0_26 = arith.constant 0 : index
    %c2_27 = arith.constant 2 : index
    %c0_28 = arith.constant 0 : index
    %c0_29 = arith.constant 0 : index
    %29 = vector.load %arg3[%c0_26, %c2_27, %c0_28, %c0_29] : memref<1x4x2x128xf32, #tpu.memory_space<vmem>>, vector<1x1x2x128xf32>
    %30 = vector.shape_cast %29 : vector<1x1x2x128xf32> to vector<2x128xf32>
    %31 = vector.broadcast %28 : f32 to vector<2x128xf32>
    %32 = arith.mulf %31, %30 : vector<2x128xf32>
    %33 = arith.addf %27, %32 : vector<2x128xf32>
    %34 = arith.addf %22, %33 : vector<2x128xf32>
    %c3 = arith.constant 3 : index
    %c0_30 = arith.constant 0 : index
    %35 = memref.load %arg4[%c3, %c0_30] : memref<8x4xf32, #tpu.memory_space<smem>>
    %c0_31 = arith.constant 0 : index
    %c3_32 = arith.constant 3 : index
    %c0_33 = arith.constant 0 : index
    %c0_34 = arith.constant 0 : index
    %36 = vector.load %arg2[%c0_31, %c3_32, %c0_33, %c0_34] : memref<1x4x2x128xf32, #tpu.memory_space<vmem>>, vector<1x1x2x128xf32>
    %37 = vector.shape_cast %36 : vector<1x1x2x128xf32> to vector<2x128xf32>
    %38 = vector.broadcast %35 : f32 to vector<2x128xf32>
    %39 = arith.mulf %38, %37 : vector<2x128xf32>
    %c7 = arith.constant 7 : index
    %c0_35 = arith.constant 0 : index
    %40 = memref.load %arg4[%c7, %c0_35] : memref<8x4xf32, #tpu.memory_space<smem>>
    %c0_36 = arith.constant 0 : index
    %c3_37 = arith.constant 3 : index
    %c0_38 = arith.constant 0 : index
    %c0_39 = arith.constant 0 : index
    %41 = vector.load %arg3[%c0_36, %c3_37, %c0_38, %c0_39] : memref<1x4x2x128xf32, #tpu.memory_space<vmem>>, vector<1x1x2x128xf32>
    %42 = vector.shape_cast %41 : vector<1x1x2x128xf32> to vector<2x128xf32>
    %43 = vector.broadcast %40 : f32 to vector<2x128xf32>
    %44 = arith.mulf %43, %42 : vector<2x128xf32>
    %45 = arith.addf %39, %44 : vector<2x128xf32>
    %46 = arith.addf %34, %45 : vector<2x128xf32>
    %c0_40 = arith.constant 0 : index
    %47 = memref.load %arg5[%c0_40] : memref<4xf32, #tpu.memory_space<smem>>
    %48 = vector.broadcast %47 : f32 to vector<2x128xf32>
    %49 = arith.addf %46, %48 : vector<2x128xf32>
    %cst = arith.constant 0.000000e+00 : f32
    %50 = vector.broadcast %cst : f32 to vector<2x128xf32>
    %51 = arith.maximumf %49, %50 : vector<2x128xf32>
    %c0_41 = arith.constant 0 : index
    %c0_42 = arith.constant 0 : index
    %52 = memref.load %arg6[%c0_41, %c0_42] : memref<4x2xf32, #tpu.memory_space<smem>>
    %53 = vector.broadcast %52 : f32 to vector<2x128xf32>
    %54 = arith.mulf %53, %51 : vector<2x128xf32>
    %c0_43 = arith.constant 0 : index
    %c1_44 = arith.constant 1 : index
    %55 = memref.load %arg6[%c0_43, %c1_44] : memref<4x2xf32, #tpu.memory_space<smem>>
    %56 = vector.broadcast %55 : f32 to vector<2x128xf32>
    %57 = arith.mulf %56, %51 : vector<2x128xf32>
    %c0_45 = arith.constant 0 : index
    %c1_46 = arith.constant 1 : index
    %58 = memref.load %arg4[%c0_45, %c1_46] : memref<8x4xf32, #tpu.memory_space<smem>>
    %c0_47 = arith.constant 0 : index
    %c0_48 = arith.constant 0 : index
    %c0_49 = arith.constant 0 : index
    %c0_50 = arith.constant 0 : index
    %59 = vector.load %arg2[%c0_47, %c0_48, %c0_49, %c0_50] : memref<1x4x2x128xf32, #tpu.memory_space<vmem>>, vector<1x1x2x128xf32>
    %60 = vector.shape_cast %59 : vector<1x1x2x128xf32> to vector<2x128xf32>
    %61 = vector.broadcast %58 : f32 to vector<2x128xf32>
    %62 = arith.mulf %61, %60 : vector<2x128xf32>
    %c4_51 = arith.constant 4 : index
    %c1_52 = arith.constant 1 : index
    %63 = memref.load %arg4[%c4_51, %c1_52] : memref<8x4xf32, #tpu.memory_space<smem>>
    %c0_53 = arith.constant 0 : index
    %c0_54 = arith.constant 0 : index
    %c0_55 = arith.constant 0 : index
    %c0_56 = arith.constant 0 : index
    %64 = vector.load %arg3[%c0_53, %c0_54, %c0_55, %c0_56] : memref<1x4x2x128xf32, #tpu.memory_space<vmem>>, vector<1x1x2x128xf32>
    %65 = vector.shape_cast %64 : vector<1x1x2x128xf32> to vector<2x128xf32>
    %66 = vector.broadcast %63 : f32 to vector<2x128xf32>
    %67 = arith.mulf %66, %65 : vector<2x128xf32>
    %68 = arith.addf %62, %67 : vector<2x128xf32>
    %c1_57 = arith.constant 1 : index
    %c1_58 = arith.constant 1 : index
    %69 = memref.load %arg4[%c1_57, %c1_58] : memref<8x4xf32, #tpu.memory_space<smem>>
    %c0_59 = arith.constant 0 : index
    %c1_60 = arith.constant 1 : index
    %c0_61 = arith.constant 0 : index
    %c0_62 = arith.constant 0 : index
    %70 = vector.load %arg2[%c0_59, %c1_60, %c0_61, %c0_62] : memref<1x4x2x128xf32, #tpu.memory_space<vmem>>, vector<1x1x2x128xf32>
    %71 = vector.shape_cast %70 : vector<1x1x2x128xf32> to vector<2x128xf32>
    %72 = vector.broadcast %69 : f32 to vector<2x128xf32>
    %73 = arith.mulf %72, %71 : vector<2x128xf32>
    %c5_63 = arith.constant 5 : index
    %c1_64 = arith.constant 1 : index
    %74 = memref.load %arg4[%c5_63, %c1_64] : memref<8x4xf32, #tpu.memory_space<smem>>
    %c0_65 = arith.constant 0 : index
    %c1_66 = arith.constant 1 : index
    %c0_67 = arith.constant 0 : index
    %c0_68 = arith.constant 0 : index
    %75 = vector.load %arg3[%c0_65, %c1_66, %c0_67, %c0_68] : memref<1x4x2x128xf32, #tpu.memory_space<vmem>>, vector<1x1x2x128xf32>
    %76 = vector.shape_cast %75 : vector<1x1x2x128xf32> to vector<2x128xf32>
    %77 = vector.broadcast %74 : f32 to vector<2x128xf32>
    %78 = arith.mulf %77, %76 : vector<2x128xf32>
    %79 = arith.addf %73, %78 : vector<2x128xf32>
    %80 = arith.addf %68, %79 : vector<2x128xf32>
    %c2_69 = arith.constant 2 : index
    %c1_70 = arith.constant 1 : index
    %81 = memref.load %arg4[%c2_69, %c1_70] : memref<8x4xf32, #tpu.memory_space<smem>>
    %c0_71 = arith.constant 0 : index
    %c2_72 = arith.constant 2 : index
    %c0_73 = arith.constant 0 : index
    %c0_74 = arith.constant 0 : index
    %82 = vector.load %arg2[%c0_71, %c2_72, %c0_73, %c0_74] : memref<1x4x2x128xf32, #tpu.memory_space<vmem>>, vector<1x1x2x128xf32>
    %83 = vector.shape_cast %82 : vector<1x1x2x128xf32> to vector<2x128xf32>
    %84 = vector.broadcast %81 : f32 to vector<2x128xf32>
    %85 = arith.mulf %84, %83 : vector<2x128xf32>
    %c6_75 = arith.constant 6 : index
    %c1_76 = arith.constant 1 : index
    %86 = memref.load %arg4[%c6_75, %c1_76] : memref<8x4xf32, #tpu.memory_space<smem>>
    %c0_77 = arith.constant 0 : index
    %c2_78 = arith.constant 2 : index
    %c0_79 = arith.constant 0 : index
    %c0_80 = arith.constant 0 : index
    %87 = vector.load %arg3[%c0_77, %c2_78, %c0_79, %c0_80] : memref<1x4x2x128xf32, #tpu.memory_space<vmem>>, vector<1x1x2x128xf32>
    %88 = vector.shape_cast %87 : vector<1x1x2x128xf32> to vector<2x128xf32>
    %89 = vector.broadcast %86 : f32 to vector<2x128xf32>
    %90 = arith.mulf %89, %88 : vector<2x128xf32>
    %91 = arith.addf %85, %90 : vector<2x128xf32>
    %92 = arith.addf %80, %91 : vector<2x128xf32>
    %c3_81 = arith.constant 3 : index
    %c1_82 = arith.constant 1 : index
    %93 = memref.load %arg4[%c3_81, %c1_82] : memref<8x4xf32, #tpu.memory_space<smem>>
    %c0_83 = arith.constant 0 : index
    %c3_84 = arith.constant 3 : index
    %c0_85 = arith.constant 0 : index
    %c0_86 = arith.constant 0 : index
    %94 = vector.load %arg2[%c0_83, %c3_84, %c0_85, %c0_86] : memref<1x4x2x128xf32, #tpu.memory_space<vmem>>, vector<1x1x2x128xf32>
    %95 = vector.shape_cast %94 : vector<1x1x2x128xf32> to vector<2x128xf32>
    %96 = vector.broadcast %93 : f32 to vector<2x128xf32>
    %97 = arith.mulf %96, %95 : vector<2x128xf32>
    %c7_87 = arith.constant 7 : index
    %c1_88 = arith.constant 1 : index
    %98 = memref.load %arg4[%c7_87, %c1_88] : memref<8x4xf32, #tpu.memory_space<smem>>
    %c0_89 = arith.constant 0 : index
    %c3_90 = arith.constant 3 : index
    %c0_91 = arith.constant 0 : index
    %c0_92 = arith.constant 0 : index
    %99 = vector.load %arg3[%c0_89, %c3_90, %c0_91, %c0_92] : memref<1x4x2x128xf32, #tpu.memory_space<vmem>>, vector<1x1x2x128xf32>
    %100 = vector.shape_cast %99 : vector<1x1x2x128xf32> to vector<2x128xf32>
    %101 = vector.broadcast %98 : f32 to vector<2x128xf32>
    %102 = arith.mulf %101, %100 : vector<2x128xf32>
    %103 = arith.addf %97, %102 : vector<2x128xf32>
    %104 = arith.addf %92, %103 : vector<2x128xf32>
    %c1_93 = arith.constant 1 : index
    %105 = memref.load %arg5[%c1_93] : memref<4xf32, #tpu.memory_space<smem>>
    %106 = vector.broadcast %105 : f32 to vector<2x128xf32>
    %107 = arith.addf %104, %106 : vector<2x128xf32>
    %cst_94 = arith.constant 0.000000e+00 : f32
    %108 = vector.broadcast %cst_94 : f32 to vector<2x128xf32>
    %109 = arith.maximumf %107, %108 : vector<2x128xf32>
    %c1_95 = arith.constant 1 : index
    %c0_96 = arith.constant 0 : index
    %110 = memref.load %arg6[%c1_95, %c0_96] : memref<4x2xf32, #tpu.memory_space<smem>>
    %111 = vector.broadcast %110 : f32 to vector<2x128xf32>
    %112 = arith.mulf %111, %109 : vector<2x128xf32>
    %c1_97 = arith.constant 1 : index
    %c1_98 = arith.constant 1 : index
    %113 = memref.load %arg6[%c1_97, %c1_98] : memref<4x2xf32, #tpu.memory_space<smem>>
    %114 = vector.broadcast %113 : f32 to vector<2x128xf32>
    %115 = arith.mulf %114, %109 : vector<2x128xf32>
    %116 = arith.addf %54, %112 : vector<2x128xf32>
    %117 = arith.addf %57, %115 : vector<2x128xf32>
    %c0_99 = arith.constant 0 : index
    %c2_100 = arith.constant 2 : index
    %118 = memref.load %arg4[%c0_99, %c2_100] : memref<8x4xf32, #tpu.memory_space<smem>>
    %c0_101 = arith.constant 0 : index
    %c0_102 = arith.constant 0 : index
    %c0_103 = arith.constant 0 : index
    %c0_104 = arith.constant 0 : index
    %119 = vector.load %arg2[%c0_101, %c0_102, %c0_103, %c0_104] : memref<1x4x2x128xf32, #tpu.memory_space<vmem>>, vector<1x1x2x128xf32>
    %120 = vector.shape_cast %119 : vector<1x1x2x128xf32> to vector<2x128xf32>
    %121 = vector.broadcast %118 : f32 to vector<2x128xf32>
    %122 = arith.mulf %121, %120 : vector<2x128xf32>
    %c4_105 = arith.constant 4 : index
    %c2_106 = arith.constant 2 : index
    %123 = memref.load %arg4[%c4_105, %c2_106] : memref<8x4xf32, #tpu.memory_space<smem>>
    %c0_107 = arith.constant 0 : index
    %c0_108 = arith.constant 0 : index
    %c0_109 = arith.constant 0 : index
    %c0_110 = arith.constant 0 : index
    %124 = vector.load %arg3[%c0_107, %c0_108, %c0_109, %c0_110] : memref<1x4x2x128xf32, #tpu.memory_space<vmem>>, vector<1x1x2x128xf32>
    %125 = vector.shape_cast %124 : vector<1x1x2x128xf32> to vector<2x128xf32>
    %126 = vector.broadcast %123 : f32 to vector<2x128xf32>
    %127 = arith.mulf %126, %125 : vector<2x128xf32>
    %128 = arith.addf %122, %127 : vector<2x128xf32>
    %c1_111 = arith.constant 1 : index
    %c2_112 = arith.constant 2 : index
    %129 = memref.load %arg4[%c1_111, %c2_112] : memref<8x4xf32, #tpu.memory_space<smem>>
    %c0_113 = arith.constant 0 : index
    %c1_114 = arith.constant 1 : index
    %c0_115 = arith.constant 0 : index
    %c0_116 = arith.constant 0 : index
    %130 = vector.load %arg2[%c0_113, %c1_114, %c0_115, %c0_116] : memref<1x4x2x128xf32, #tpu.memory_space<vmem>>, vector<1x1x2x128xf32>
    %131 = vector.shape_cast %130 : vector<1x1x2x128xf32> to vector<2x128xf32>
    %132 = vector.broadcast %129 : f32 to vector<2x128xf32>
    %133 = arith.mulf %132, %131 : vector<2x128xf32>
    %c5_117 = arith.constant 5 : index
    %c2_118 = arith.constant 2 : index
    %134 = memref.load %arg4[%c5_117, %c2_118] : memref<8x4xf32, #tpu.memory_space<smem>>
    %c0_119 = arith.constant 0 : index
    %c1_120 = arith.constant 1 : index
    %c0_121 = arith.constant 0 : index
    %c0_122 = arith.constant 0 : index
    %135 = vector.load %arg3[%c0_119, %c1_120, %c0_121, %c0_122] : memref<1x4x2x128xf32, #tpu.memory_space<vmem>>, vector<1x1x2x128xf32>
    %136 = vector.shape_cast %135 : vector<1x1x2x128xf32> to vector<2x128xf32>
    %137 = vector.broadcast %134 : f32 to vector<2x128xf32>
    %138 = arith.mulf %137, %136 : vector<2x128xf32>
    %139 = arith.addf %133, %138 : vector<2x128xf32>
    %140 = arith.addf %128, %139 : vector<2x128xf32>
    %c2_123 = arith.constant 2 : index
    %c2_124 = arith.constant 2 : index
    %141 = memref.load %arg4[%c2_123, %c2_124] : memref<8x4xf32, #tpu.memory_space<smem>>
    %c0_125 = arith.constant 0 : index
    %c2_126 = arith.constant 2 : index
    %c0_127 = arith.constant 0 : index
    %c0_128 = arith.constant 0 : index
    %142 = vector.load %arg2[%c0_125, %c2_126, %c0_127, %c0_128] : memref<1x4x2x128xf32, #tpu.memory_space<vmem>>, vector<1x1x2x128xf32>
    %143 = vector.shape_cast %142 : vector<1x1x2x128xf32> to vector<2x128xf32>
    %144 = vector.broadcast %141 : f32 to vector<2x128xf32>
    %145 = arith.mulf %144, %143 : vector<2x128xf32>
    %c6_129 = arith.constant 6 : index
    %c2_130 = arith.constant 2 : index
    %146 = memref.load %arg4[%c6_129, %c2_130] : memref<8x4xf32, #tpu.memory_space<smem>>
    %c0_131 = arith.constant 0 : index
    %c2_132 = arith.constant 2 : index
    %c0_133 = arith.constant 0 : index
    %c0_134 = arith.constant 0 : index
    %147 = vector.load %arg3[%c0_131, %c2_132, %c0_133, %c0_134] : memref<1x4x2x128xf32, #tpu.memory_space<vmem>>, vector<1x1x2x128xf32>
    %148 = vector.shape_cast %147 : vector<1x1x2x128xf32> to vector<2x128xf32>
    %149 = vector.broadcast %146 : f32 to vector<2x128xf32>
    %150 = arith.mulf %149, %148 : vector<2x128xf32>
    %151 = arith.addf %145, %150 : vector<2x128xf32>
    %152 = arith.addf %140, %151 : vector<2x128xf32>
    %c3_135 = arith.constant 3 : index
    %c2_136 = arith.constant 2 : index
    %153 = memref.load %arg4[%c3_135, %c2_136] : memref<8x4xf32, #tpu.memory_space<smem>>
    %c0_137 = arith.constant 0 : index
    %c3_138 = arith.constant 3 : index
    %c0_139 = arith.constant 0 : index
    %c0_140 = arith.constant 0 : index
    %154 = vector.load %arg2[%c0_137, %c3_138, %c0_139, %c0_140] : memref<1x4x2x128xf32, #tpu.memory_space<vmem>>, vector<1x1x2x128xf32>
    %155 = vector.shape_cast %154 : vector<1x1x2x128xf32> to vector<2x128xf32>
    %156 = vector.broadcast %153 : f32 to vector<2x128xf32>
    %157 = arith.mulf %156, %155 : vector<2x128xf32>
    %c7_141 = arith.constant 7 : index
    %c2_142 = arith.constant 2 : index
    %158 = memref.load %arg4[%c7_141, %c2_142] : memref<8x4xf32, #tpu.memory_space<smem>>
    %c0_143 = arith.constant 0 : index
    %c3_144 = arith.constant 3 : index
    %c0_145 = arith.constant 0 : index
    %c0_146 = arith.constant 0 : index
    %159 = vector.load %arg3[%c0_143, %c3_144, %c0_145, %c0_146] : memref<1x4x2x128xf32, #tpu.memory_space<vmem>>, vector<1x1x2x128xf32>
    %160 = vector.shape_cast %159 : vector<1x1x2x128xf32> to vector<2x128xf32>
    %161 = vector.broadcast %158 : f32 to vector<2x128xf32>
    %162 = arith.mulf %161, %160 : vector<2x128xf32>
    %163 = arith.addf %157, %162 : vector<2x128xf32>
    %164 = arith.addf %152, %163 : vector<2x128xf32>
    %c2_147 = arith.constant 2 : index
    %165 = memref.load %arg5[%c2_147] : memref<4xf32, #tpu.memory_space<smem>>
    %166 = vector.broadcast %165 : f32 to vector<2x128xf32>
    %167 = arith.addf %164, %166 : vector<2x128xf32>
    %cst_148 = arith.constant 0.000000e+00 : f32
    %168 = vector.broadcast %cst_148 : f32 to vector<2x128xf32>
    %169 = arith.maximumf %167, %168 : vector<2x128xf32>
    %c2_149 = arith.constant 2 : index
    %c0_150 = arith.constant 0 : index
    %170 = memref.load %arg6[%c2_149, %c0_150] : memref<4x2xf32, #tpu.memory_space<smem>>
    %171 = vector.broadcast %170 : f32 to vector<2x128xf32>
    %172 = arith.mulf %171, %169 : vector<2x128xf32>
    %c2_151 = arith.constant 2 : index
    %c1_152 = arith.constant 1 : index
    %173 = memref.load %arg6[%c2_151, %c1_152] : memref<4x2xf32, #tpu.memory_space<smem>>
    %174 = vector.broadcast %173 : f32 to vector<2x128xf32>
    %175 = arith.mulf %174, %169 : vector<2x128xf32>
    %176 = arith.addf %116, %172 : vector<2x128xf32>
    %177 = arith.addf %117, %175 : vector<2x128xf32>
    %c0_153 = arith.constant 0 : index
    %c3_154 = arith.constant 3 : index
    %178 = memref.load %arg4[%c0_153, %c3_154] : memref<8x4xf32, #tpu.memory_space<smem>>
    %c0_155 = arith.constant 0 : index
    %c0_156 = arith.constant 0 : index
    %c0_157 = arith.constant 0 : index
    %c0_158 = arith.constant 0 : index
    %179 = vector.load %arg2[%c0_155, %c0_156, %c0_157, %c0_158] : memref<1x4x2x128xf32, #tpu.memory_space<vmem>>, vector<1x1x2x128xf32>
    %180 = vector.shape_cast %179 : vector<1x1x2x128xf32> to vector<2x128xf32>
    %181 = vector.broadcast %178 : f32 to vector<2x128xf32>
    %182 = arith.mulf %181, %180 : vector<2x128xf32>
    %c4_159 = arith.constant 4 : index
    %c3_160 = arith.constant 3 : index
    %183 = memref.load %arg4[%c4_159, %c3_160] : memref<8x4xf32, #tpu.memory_space<smem>>
    %c0_161 = arith.constant 0 : index
    %c0_162 = arith.constant 0 : index
    %c0_163 = arith.constant 0 : index
    %c0_164 = arith.constant 0 : index
    %184 = vector.load %arg3[%c0_161, %c0_162, %c0_163, %c0_164] : memref<1x4x2x128xf32, #tpu.memory_space<vmem>>, vector<1x1x2x128xf32>
    %185 = vector.shape_cast %184 : vector<1x1x2x128xf32> to vector<2x128xf32>
    %186 = vector.broadcast %183 : f32 to vector<2x128xf32>
    %187 = arith.mulf %186, %185 : vector<2x128xf32>
    %188 = arith.addf %182, %187 : vector<2x128xf32>
    %c1_165 = arith.constant 1 : index
    %c3_166 = arith.constant 3 : index
    %189 = memref.load %arg4[%c1_165, %c3_166] : memref<8x4xf32, #tpu.memory_space<smem>>
    %c0_167 = arith.constant 0 : index
    %c1_168 = arith.constant 1 : index
    %c0_169 = arith.constant 0 : index
    %c0_170 = arith.constant 0 : index
    %190 = vector.load %arg2[%c0_167, %c1_168, %c0_169, %c0_170] : memref<1x4x2x128xf32, #tpu.memory_space<vmem>>, vector<1x1x2x128xf32>
    %191 = vector.shape_cast %190 : vector<1x1x2x128xf32> to vector<2x128xf32>
    %192 = vector.broadcast %189 : f32 to vector<2x128xf32>
    %193 = arith.mulf %192, %191 : vector<2x128xf32>
    %c5_171 = arith.constant 5 : index
    %c3_172 = arith.constant 3 : index
    %194 = memref.load %arg4[%c5_171, %c3_172] : memref<8x4xf32, #tpu.memory_space<smem>>
    %c0_173 = arith.constant 0 : index
    %c1_174 = arith.constant 1 : index
    %c0_175 = arith.constant 0 : index
    %c0_176 = arith.constant 0 : index
    %195 = vector.load %arg3[%c0_173, %c1_174, %c0_175, %c0_176] : memref<1x4x2x128xf32, #tpu.memory_space<vmem>>, vector<1x1x2x128xf32>
    %196 = vector.shape_cast %195 : vector<1x1x2x128xf32> to vector<2x128xf32>
    %197 = vector.broadcast %194 : f32 to vector<2x128xf32>
    %198 = arith.mulf %197, %196 : vector<2x128xf32>
    %199 = arith.addf %193, %198 : vector<2x128xf32>
    %200 = arith.addf %188, %199 : vector<2x128xf32>
    %c2_177 = arith.constant 2 : index
    %c3_178 = arith.constant 3 : index
    %201 = memref.load %arg4[%c2_177, %c3_178] : memref<8x4xf32, #tpu.memory_space<smem>>
    %c0_179 = arith.constant 0 : index
    %c2_180 = arith.constant 2 : index
    %c0_181 = arith.constant 0 : index
    %c0_182 = arith.constant 0 : index
    %202 = vector.load %arg2[%c0_179, %c2_180, %c0_181, %c0_182] : memref<1x4x2x128xf32, #tpu.memory_space<vmem>>, vector<1x1x2x128xf32>
    %203 = vector.shape_cast %202 : vector<1x1x2x128xf32> to vector<2x128xf32>
    %204 = vector.broadcast %201 : f32 to vector<2x128xf32>
    %205 = arith.mulf %204, %203 : vector<2x128xf32>
    %c6_183 = arith.constant 6 : index
    %c3_184 = arith.constant 3 : index
    %206 = memref.load %arg4[%c6_183, %c3_184] : memref<8x4xf32, #tpu.memory_space<smem>>
    %c0_185 = arith.constant 0 : index
    %c2_186 = arith.constant 2 : index
    %c0_187 = arith.constant 0 : index
    %c0_188 = arith.constant 0 : index
    %207 = vector.load %arg3[%c0_185, %c2_186, %c0_187, %c0_188] : memref<1x4x2x128xf32, #tpu.memory_space<vmem>>, vector<1x1x2x128xf32>
    %208 = vector.shape_cast %207 : vector<1x1x2x128xf32> to vector<2x128xf32>
    %209 = vector.broadcast %206 : f32 to vector<2x128xf32>
    %210 = arith.mulf %209, %208 : vector<2x128xf32>
    %211 = arith.addf %205, %210 : vector<2x128xf32>
    %212 = arith.addf %200, %211 : vector<2x128xf32>
    %c3_189 = arith.constant 3 : index
    %c3_190 = arith.constant 3 : index
    %213 = memref.load %arg4[%c3_189, %c3_190] : memref<8x4xf32, #tpu.memory_space<smem>>
    %c0_191 = arith.constant 0 : index
    %c3_192 = arith.constant 3 : index
    %c0_193 = arith.constant 0 : index
    %c0_194 = arith.constant 0 : index
    %214 = vector.load %arg2[%c0_191, %c3_192, %c0_193, %c0_194] : memref<1x4x2x128xf32, #tpu.memory_space<vmem>>, vector<1x1x2x128xf32>
    %215 = vector.shape_cast %214 : vector<1x1x2x128xf32> to vector<2x128xf32>
    %216 = vector.broadcast %213 : f32 to vector<2x128xf32>
    %217 = arith.mulf %216, %215 : vector<2x128xf32>
    %c7_195 = arith.constant 7 : index
    %c3_196 = arith.constant 3 : index
    %218 = memref.load %arg4[%c7_195, %c3_196] : memref<8x4xf32, #tpu.memory_space<smem>>
    %c0_197 = arith.constant 0 : index
    %c3_198 = arith.constant 3 : index
    %c0_199 = arith.constant 0 : index
    %c0_200 = arith.constant 0 : index
    %219 = vector.load %arg3[%c0_197, %c3_198, %c0_199, %c0_200] : memref<1x4x2x128xf32, #tpu.memory_space<vmem>>, vector<1x1x2x128xf32>
    %220 = vector.shape_cast %219 : vector<1x1x2x128xf32> to vector<2x128xf32>
    %221 = vector.broadcast %218 : f32 to vector<2x128xf32>
    %222 = arith.mulf %221, %220 : vector<2x128xf32>
    %223 = arith.addf %217, %222 : vector<2x128xf32>
    %224 = arith.addf %212, %223 : vector<2x128xf32>
    %c3_201 = arith.constant 3 : index
    %225 = memref.load %arg5[%c3_201] : memref<4xf32, #tpu.memory_space<smem>>
    %226 = vector.broadcast %225 : f32 to vector<2x128xf32>
    %227 = arith.addf %224, %226 : vector<2x128xf32>
    %cst_202 = arith.constant 0.000000e+00 : f32
    %228 = vector.broadcast %cst_202 : f32 to vector<2x128xf32>
    %229 = arith.maximumf %227, %228 : vector<2x128xf32>
    %c3_203 = arith.constant 3 : index
    %c0_204 = arith.constant 0 : index
    %230 = memref.load %arg6[%c3_203, %c0_204] : memref<4x2xf32, #tpu.memory_space<smem>>
    %231 = vector.broadcast %230 : f32 to vector<2x128xf32>
    %232 = arith.mulf %231, %229 : vector<2x128xf32>
    %c3_205 = arith.constant 3 : index
    %c1_206 = arith.constant 1 : index
    %233 = memref.load %arg6[%c3_205, %c1_206] : memref<4x2xf32, #tpu.memory_space<smem>>
    %234 = vector.broadcast %233 : f32 to vector<2x128xf32>
    %235 = arith.mulf %234, %229 : vector<2x128xf32>
    %236 = arith.addf %176, %232 : vector<2x128xf32>
    %237 = arith.addf %177, %235 : vector<2x128xf32>
    %c0_207 = arith.constant 0 : index
    %238 = memref.load %arg7[%c0_207] : memref<2xf32, #tpu.memory_space<smem>>
    %239 = vector.broadcast %238 : f32 to vector<2x128xf32>
    %240 = arith.addf %236, %239 : vector<2x128xf32>
    %241 = arith.negf %240 : vector<2x128xf32>
    %242 = math.exp %241 : vector<2x128xf32>
    %cst_208 = arith.constant 1.000000e+00 : f32
    %243 = vector.broadcast %cst_208 : f32 to vector<2x128xf32>
    %244 = arith.addf %243, %242 : vector<2x128xf32>
    %245 = arith.divf %243, %244 : vector<2x128xf32>
    %c0_209 = arith.constant 0 : index
    %c0_210 = arith.constant 0 : index
    %c0_211 = arith.constant 0 : index
    %c0_212 = arith.constant 0 : index
    %246 = vector.load %arg8[%c0_209, %c0_210, %c0_211, %c0_212] : memref<2x1x2x128xf32, #tpu.memory_space<vmem>>, vector<1x1x2x128xf32>
    %247 = vector.shape_cast %246 : vector<1x1x2x128xf32> to vector<2x128xf32>
    %248 = vector.shape_cast %245 : vector<2x128xf32> to vector<1x1x2x128xf32>
    tpu.vector_store %arg8[%c0_209, %c0_210, %c0_211, %c0_212], %248 {strides = array<i32>} : memref<2x1x2x128xf32, #tpu.memory_space<vmem>>, vector<1x1x2x128xf32>,
    %c1_213 = arith.constant 1 : index
    %249 = memref.load %arg7[%c1_213] : memref<2xf32, #tpu.memory_space<smem>>
    %250 = vector.broadcast %249 : f32 to vector<2x128xf32>
    %251 = arith.addf %237, %250 : vector<2x128xf32>
    %252 = arith.negf %251 : vector<2x128xf32>
    %253 = math.exp %252 : vector<2x128xf32>
    %cst_214 = arith.constant 1.000000e+00 : f32
    %254 = vector.broadcast %cst_214 : f32 to vector<2x128xf32>
    %255 = arith.addf %254, %253 : vector<2x128xf32>
    %256 = arith.divf %254, %255 : vector<2x128xf32>
    %c1_215 = arith.constant 1 : index
    %c0_216 = arith.constant 0 : index
    %c0_217 = arith.constant 0 : index
    %c0_218 = arith.constant 0 : index
    %257 = vector.load %arg8[%c1_215, %c0_216, %c0_217, %c0_218] : memref<2x1x2x128xf32, #tpu.memory_space<vmem>>, vector<1x1x2x128xf32>
    %258 = vector.shape_cast %257 : vector<1x1x2x128xf32> to vector<2x128xf32>
    %259 = vector.shape_cast %256 : vector<2x128xf32> to vector<1x1x2x128xf32>
    tpu.vector_store %arg8[%c1_215, %c0_216, %c0_217, %c0_218], %259 {strides = array<i32>} : memref<2x1x2x128xf32, #tpu.memory_space<vmem>>, vector<1x1x2x128xf32>,
    return
  }
  func.func @transform_0(%arg0: i32, %arg1: i32) -> (i32, i32, i32, i32) {
    %c0_i32 = arith.constant 0 : i32
    %c0_i32_0 = arith.constant 0 : i32
    %c0_i32_1 = arith.constant 0 : i32
    return %arg0, %c0_i32, %arg1, %c0_i32_0 : i32, i32, i32, i32
  }
  func.func @transform_1(%arg0: i32, %arg1: i32) -> (i32, i32, i32, i32) {
    %c0_i32 = arith.constant 0 : i32
    %c0_i32_0 = arith.constant 0 : i32
    %c0_i32_1 = arith.constant 0 : i32
    return %arg0, %c0_i32, %arg1, %c0_i32_0 : i32, i32, i32, i32
  }
  func.func @transform_2(%arg0: i32, %arg1: i32) -> (i32, i32) {
    %c0_i32 = arith.constant 0 : i32
    %c0_i32_0 = arith.constant 0 : i32
    %c0_i32_1 = arith.constant 0 : i32
    return %c0_i32, %c0_i32_0 : i32, i32
  }
  func.func @transform_3(%arg0: i32, %arg1: i32) -> i32 {
    %c0_i32 = arith.constant 0 : i32
    %c0_i32_0 = arith.constant 0 : i32
    return %c0_i32 : i32
  }
  func.func @transform_4(%arg0: i32, %arg1: i32) -> (i32, i32) {
    %c0_i32 = arith.constant 0 : i32
    %c0_i32_0 = arith.constant 0 : i32
    %c0_i32_1 = arith.constant 0 : i32
    return %c0_i32, %c0_i32_0 : i32, i32
  }
  func.func @transform_5(%arg0: i32, %arg1: i32) -> i32 {
    %c0_i32 = arith.constant 0 : i32
    %c0_i32_0 = arith.constant 0 : i32
    return %c0_i32 : i32
  }
  func.func @transform_6(%arg0: i32, %arg1: i32) -> (i32, i32, i32, i32) {
    %c0_i32 = arith.constant 0 : i32
    %c0_i32_0 = arith.constant 0 : i32
    %c0_i32_1 = arith.constant 0 : i32
    return %c0_i32, %arg0, %arg1, %c0_i32_0 : i32, i32, i32, i32
  }
}

</mosaic_0001>

<bundles_post_ra>
// kernel: tpu_custom_call.1
= control target key start
LH: loop header
LB: loop body
LE: loop exit
PB: predicated region body
PF: predicated region fallthrough
CT: control target
= control target key end

     0   :  { %s1468_s0 = inlined_call_operand.vmem [shape: f32[2,4,2,128], index: 0, kind: input, shape index: {}]   ;;  %s1469_s1 = inlined_call_operand.hbm [shape: f32[2,4,2,128], index: 1, kind: input, shape index: {}]   ;;  %s1470_s2 = inlined_call_operand.vmem [shape: f32[8,4], index: 2, kind: input, shape index: {}]   ;;  %s1471_s3 = inlined_call_operand.vmem [shape: f32[4], index: 3, kind: input, shape index: {}]   ;;  %s1472_s4 = inlined_call_operand.vmem [shape: f32[4,2], index: 4, kind: input, shape index: {}]   ;;  %s1473_s5 = inlined_call_operand.vmem [shape: f32[2], index: 5, kind: input, shape index: {}]   ;;  %s1474_s6 = inlined_call_operand.hbm [shape: f32[2,2,2,128], index: 6, kind: output, shape index: {}]  }
   0x1   :  { %1475 = sst [smem:[#allocation18_spill]] %s1470_s2 }
   0x2   :  { %1476 = sst [smem:[#allocation19_spill]] %s1471_s3 }
   0x3   :  { %1477 = sst [smem:[#allocation20_spill]] %s1472_s4 }
   0x4   :  { %1478 = sst [smem:[#allocation21_spill]] %s1473_s5 }
   0x5   :  { %11 = vsyncpa [#allocation3], 0 }
   0x6   :  { %13 = vsyncpa [#allocation3 + $0x1], 0 }
   0x7   :  { %14 = vsyncpa [#allocation5], 0 }
   0x8   :  { %15 = vsyncpa [#allocation8], 0 }
   0x9   :  { %16 = vsyncpa [#allocation11], 0 }
   0xa   :  { %17 = vsyncpa [#allocation4], 0 }
   0xb   :  { %19 = vsyncpa [#allocation4 + $0x1], 0  ;;  %s1185_s21 = smov 0   ;;  %s1187_s22 = smov 0  }
   0xc   :  { %s1189_s23 = smov 0   ;;  %s1191_s24 = smov 0  }
   0xd   :  { %s1193_s25 = smov 0   ;;  %s1195_s26 = smov 0  }
   0xe LB: > { %s762_s27 = sadd.s32 4294967295, %s1139_s26   ;;  %s763_s28 = sadd.s32 4294967294, %s1139_s26   ;;  %s1139_s26 = sphi %s1195_s26, %s25_s26   ;;  %s1135_s25 = sphi %s1193_s25, %s1494_s25   ;;  %s1131_s24 = sphi %s1191_s24, %s1493_s24   ;;  %s1127_s23 = sphi %s1189_s23, %s1492_s23   ;;  %s1123_s22 = sphi %s1187_s22, %s1491_s22   ;;  %s1119_s21 = sphi %s1185_s21, %s1490_s21  }
   0xf   : > { %p87_p0 = scmp.ne.s32.totalorder %s1123_s22, %s1119_s21  ;;  %p1219_p1 = scmp.eq.s32.totalorder %s762_s27, 0 }
  0x10   : > { %p1223_p2 = scmp.eq.s32.totalorder %s762_s27, 1  ;;  %p203_p3 = scmp.eq.s32.totalorder %s763_s28, 1 }
  0x11   : > { %p1229_p4 = por %p1219_p1, %p87_p0  ;;  %p764_p5 = scmp.ge.s32.totalorder %s1139_s26, 1 }
  0x12   : > { %p1234_p6 = por %p203_p3, %p87_p0  ;;  %p210_p7 = scmp.lt.s32.totalorder %s1139_s26, 3 }
  0x13   : > { %s1483_s3 = sld [smem:[#allocation19_spill]]  ;;  %p769_p9 = scmp.ge.s32.totalorder %s1139_s26, 2 }
  0x14   : > { %p1242_p8 = pnand %p764_p5, %p210_p7  ;;  %s1485_s2 = sld [smem:[#allocation18_spill]] }
  0x15   : > { %s1486_s4 = sld [smem:[#allocation20_spill]]  ;;  %s1141_s19 = smov [#allocation7]  }
  0x16   : > { %p859_p10 = pneg %p1242_p8  ;;  %s1142_s20 = smov [#allocation6]  }
  0x17   : > { %s1487_s5 = sld [smem:[#allocation21_spill]]  ;;  %s1143_s10 = smov [#allocation9]  }
  0x18   : > { %p860_p11 = pnand %p859_p10, %p1219_p1  ;;  %s1144_s13 = smov [#allocation10]  }
  0x19   : > { %s232_s11 = sshll.u32 %s1483_s3, 4  ;;  %s37_s14 = sadd.s32 1, %s1135_s25  ;;  %s233_s11 = int_to_ptr.vmem [resolvable:$true] %s232_s11 }
  0x1a   : > { %s222_s15 = sshll.u32 %s1485_s2, 4  ;;  %s74_s16 = sadd.s32 1, %s1127_s23  ;;  %s223_s15 = int_to_ptr.vmem [resolvable:$true] %s222_s15 }
  0x1b   : > { %s242_s18 = sshll.u32 %s1486_s4, 4  ;;  %p39_p12 = scmp.ge.s32.totalorder %s37_s14, 2  ;;  %s243_s18 = int_to_ptr.vmem [resolvable:$true] %s242_s18 }
  0x1c   : > { %865 = dma.vmem_to_smem (!%p860_p11), %s233_s11, 16, %s1141_s19, [#allocation8]  }
  0x1d   : > { %862 = dma.vmem_to_smem (!%p860_p11), %s223_s15, 128, %s1142_s20, [#allocation5]  }
  0x1e   : > { %s252_s9 = sshll.u32 %s1487_s5, 4  ;;  %p81_p13 = scmp.ne.s32.totalorder %s1127_s23, %s1123_s22  ;;  %s253_s9 = int_to_ptr.vmem [resolvable:$true] %s252_s9 }
  0x1f   : > { %868 = dma.vmem_to_smem (!%p860_p11), %s243_s18, 64, %s1143_s10, [#allocation8]  }
  0x20   : > { %871 = dma.vmem_to_smem (!%p860_p11), %s253_s9, 16, %s1144_s13, [#allocation11]  }
  0x21   : > { %p82_p0 = scmp.eq.s32.totalorder %s1139_s26, 0  ;;  %p884_p3 = scmp.lt.s32.totalorder %s1139_s26, 2 }
  0x22   : > { %s1496_s14 = smov (%p39_p12, %s37_s14), 0  ;;  %p1274_p7 = por %p1223_p2, %p81_p13 }
  0x23   : > { %p1268_p5 = por %p82_p0, %p81_p13  ;;  %s69_s17 = ssub.s32 %s1135_s25, %s1496_s14 }
  0x24   : > { %s274_s18 = sand.u32 1, %s1127_s23   ;;  %p72_p10 = scmp.eq.s32.totalorder %s69_s17, 0 }
  0x25   : > { %s770_s19 = sshll.u32 %s274_s18, 3  ;;  %s837_s20 = sshll.u32 %s1135_s25, 3 }
  0x26   : > { %s1283_s27 = scalar_select %p72_p10, %s1127_s23, %s74_s16  }
  0x27   : > { %s284_s10 = scalar_lea.hbm %s1469_s1, %s837_s20  ;;  %s278_s2 = scalar_lea.vmem [#allocation2], %s770_s19 }
  0x28   : > { %s285_s13 = sshll.u32 %s284_s10, 4  ;;  %s287_s3 = sshll.u32 %s278_s2, 4  ;;  %s286_s13 = int_to_ptr.hbm [resolvable:$true] %s285_s13  ;;  %s288_s3 = int_to_ptr.vmem [resolvable:$true] %s287_s3 }
  0x29   : > { %p873_p2 = pnand %p884_p3, %p1268_p5  ;;  %s275_s30 = scalar_lea.sflag [#allocation3], %s274_s18 }
  0x2a   : > { %s1145_s4 = smov 32   ;;  %s1146_s5 = smov 2  }
  0x2b   : > { %875 = dma.hbm_to_vmem [thread:$0]  (!%p873_p2), %s286_s13, 128, %s288_s3, %s275_s30, %s1145_s4, %s1145_s4, %s1146_s5  }
  0x2c   : > { %299 = sbr.rel (%p1242_p8) target bundleno = 156 (0x9c), region = 44  ;;  %s1295_s16 = sand.u32 (!%p1242_p8), 1, %s1123_s22  }
  0x2d   : > { %s774_s17 = sshll.u32 (!%p1242_p8), %s1295_s16, 3  ;;  %s302_s2 = scalar_lea.sflag (!%p1242_p8), [#allocation3], %s1295_s16 }
  0x2e   : > { %s1299_s19 = scalar_lea.vmem (!%p1242_p8), [#allocation2], %s774_s17 }
  0x31   : > { %1098 = dma.done.wait (%p1229_p4), %s302_s2, 128  }
  0x32   : > { %1100 = vsyncadd (%p1229_p4), %s302_s2, 4294967168 }
  0x33   : > { %1102 = dma.done.wait (%p1219_p1), [#allocation5], 128  }
  0x34   : > { %1104 = vsyncadd (%p1219_p1), [#allocation5], 4294967168 }
  0x35   : > { %1106 = dma.done.wait (%p1219_p1), [#allocation8], 80  }
  0x36   : > { %1108 = vsyncadd (%p1219_p1), [#allocation8], 4294967216 }
  0x37   : > { %1110 = dma.done.wait (%p1219_p1), [#allocation11], 16  }
  0x38   : > { %1112 = vsyncadd (%p1219_p1), [#allocation11], 4294967280 }
  0x39   : > { %331 = sfence }
  0x3a   : > { %p364_p4 = scmp.lt.s32.totalorder %s1131_s24, 1  ;;  %s372_s3 = sld [smem:[#allocation6]]  ;;  %v1333_v0 = vld [vmem:[%s1299_s19] sm:$0x3]  ;;  %v1336_v1 = vld [vmem:[%s1299_s19 + $0x2] sm:$0x3] }
  0x3b   : > { %s782_s5 = sld [smem:[#allocation6 + $0x200]]  ;;  %v1359_v14 = vld [vmem:[%s1299_s19 + $0x4] sm:$0x3]  ;;  %v1377_v27 = vld [vmem:[%s1299_s19 + $0x6] sm:$0x3] }
  0x3c   : > { %s365_s4 = scalar_select %p364_p4, %s1131_s24, 1 }
  0x3d   : > { %s783_s7 = sld [smem:[#allocation6 + $0x80]] }
  0x3e   : > { %s838_s12 = sshll.u32 %s365_s4, 3  ;;  %s785_s11 = sld [smem:[#allocation6 + $0x280]] }
  0x3f   : > { %s1319_s18 = sld [smem:[#allocation6 + $0x100]]  ;;  %s1326_s29 = scalar_lea.vmem %s1468_s0, %s838_s12 }
  0x40   : > { %s1321_s20 = sld [smem:[#allocation6 + $0x300]]  ;;  %v1341_v2 = vld [vmem:[%s1326_s29] sm:$0x3]  ;;  %v1344_v3 = vld [vmem:[%s1326_s29 + $0x2] sm:$0x3]  ;;  %v374_v4 = vstv %s372_s3 }
  0x41   : > { %s1328_s10 = sld [smem:[#allocation6 + $0x180]]  ;;  %v378_v5 = vstv %s782_s5  ;;  %v375_v8 = vmul.f32 %v374_v4, %v1341_v2  ;;  %v1355_v12 = vld [vmem:[%s1326_s29 + $0x4] sm:$0x3]  ;;  %v1369_v21 = vld [vmem:[%s1326_s29 + $0x6] sm:$0x3] }
  0x42   : > { %s1330_s13 = sld [smem:[#allocation6 + $0x380]]  ;;  %v379_v9 = vmul.f32 %v378_v5, %v1333_v0 }
  0x43   : > { %s1338_s30 = sld [smem:[#allocation7]]  ;;  %v384_v6 = vstv %s783_s7 }
  0x44   : > { %s1346_s17 = sld [smem:[#allocation9]]  ;;  %v389_v7 = vstv %s785_s11  ;;  %v385_v10 = vmul.f32 %v1344_v3, %v384_v6  ;;  %v380_v16 = vadd.f32 %v379_v9, %v375_v8 }
  0x45   : > { %s1348_s2 = sld [smem:[#allocation9 + $0x1]]  ;;  %v390_v11 = vmul.f32 %v1336_v1, %v389_v7  ;;  %v396_v13 = vstv %s1319_s18 }
  0x46   : > { %s796_s4 = sld [smem:[#allocation6 + $0x1]]  ;;  %v401_v15 = vstv %s1321_s20  ;;  %v397_v18 = vmul.f32 %v1355_v12, %v396_v13 }
  0x47   : > { %s797_s12 = sld [smem:[#allocation6 + $0x201]]  ;;  %v391_v17 = vadd.f32 %v390_v11, %v385_v10  ;;  %v402_v20 = vmul.f32 %v1359_v14, %v401_v15  ;;  %v408_v22 = vstv %s1328_s10 }
  0x48   : > { %s798_s28 = sld [smem:[#allocation6 + $0x81]]  ;;  %v413_v28 = vstv %s1330_s13  ;;  %v409_v32 = vmul.f32 %v1369_v21, %v408_v22 }
  0x49   : > { %s799_s3 = sld [smem:[#allocation6 + $0x281]]  ;;  %v392_v31 = vadd.f32 %v391_v17, %v380_v16  ;;  %v403_v35 = vadd.f32 %v402_v20, %v397_v18  ;;  %v414_v39 = vmul.f32 %v1377_v27, %v413_v28  ;;  %v418_v60 = vstv %s1338_s30 }
  0x4a   : > { %s800_s5 = sld [smem:[#allocation6 + $0x101]] }
  0x4b   : > { %s1362_s7 = sld [smem:[#allocation6 + $0x301]]  ;;  %v404_v48 = vadd.f32 %v403_v35, %v392_v31  ;;  %v415_v49 = vadd.f32 %v414_v39, %v409_v32  ;;  %v425_v31 = vstv %s1348_s2 }
  0x4c   : > { %v428_v19 = vstv %s796_s4  ;;  %s1365_s11 = sld [smem:[#allocation6 + $0x181]] }
  0x4d   : > { %v429_v23 = vmul.f32 %v428_v19, %v1341_v2  ;;  %v431_v24 = vstv %s797_s12  ;;  %s803_s18 = sld [smem:[#allocation6 + $0x381]]  ;;  %v416_v57 = vadd.f32 %v415_v49, %v404_v48 }
  0x4e   : > { %v432_v25 = vmul.f32 %v431_v24, %v1333_v0  ;;  %v435_v26 = vstv %s798_s28  ;;  %s1374_s20 = sld [smem:[#allocation7 + $0x1]]  ;;  %v422_v24 = vstv %s1346_s17 }
  0x4f   : > { %v436_v29 = vmul.f32 %v1344_v3, %v435_v26  ;;  %v438_v30 = vstv %s799_s3  ;;  %s1381_s9 = sld [smem:[#allocation9 + $0x80]]  ;;  %v419_v10 = vadd.f32 %v418_v60, %v416_v57 }
  0x50   : > { %v439_v33 = vmul.f32 %v1336_v1, %v438_v30  ;;  %v443_v34 = vstv %s800_s5  ;;  %s1385_s29 = sld [smem:[#allocation9 + $0x81]]  ;;  %v433_v36 = vadd.f32 %v432_v25, %v429_v23 }
  0x51   : > { %v444_v37 = vmul.f32 %v1355_v12, %v443_v34  ;;  %v446_v38 = vstv %s1362_s7  ;;  %s807_s19 = sld [smem:[#allocation6 + $0x2]]  ;;  %v420_v23 = vmax.f32 %v419_v10, 0.0 }
  0x52   : > { %v440_v40 = vadd.f32 %v439_v33, %v436_v29  ;;  %v447_v41 = vmul.f32 %v1359_v14, %v446_v38  ;;  %v451_v42 = vstv %s1365_s11  ;;  %s808_s10 = sld [smem:[#allocation6 + $0x202]] }
  0x53   : > { %v454_v43 = vstv %s803_s18  ;;  %s809_s13 = sld [smem:[#allocation6 + $0x82]]  ;;  %v452_v46 = vmul.f32 %v1369_v21, %v451_v42 }
  0x54   : > { %s810_s4 = sld [smem:[#allocation6 + $0x282]]  ;;  %v441_v44 = vadd.f32 %v440_v40, %v433_v36  ;;  %v448_v45 = vadd.f32 %v447_v41, %v444_v37  ;;  %v455_v47 = vmul.f32 %v1377_v27, %v454_v43  ;;  %v459_v11 = vstv %s1374_s20 }
  0x55   : > { %s811_s12 = sld [smem:[#allocation6 + $0x102]]  ;;  %v463_v32 = vstv %s1381_s9 }
  0x56   : > { %s812_s28 = sld [smem:[#allocation6 + $0x302]]  ;;  %v449_v53 = vadd.f32 %v448_v45, %v441_v44  ;;  %v456_v54 = vadd.f32 %v455_v47, %v452_v46  ;;  %v466_v36 = vstv %s1385_s29 }
  0x57   : > { %v471_v50 = vstv %s807_s19  ;;  %s813_s3 = sld [smem:[#allocation6 + $0x182]] }
  0x58   : > { %v472_v51 = vmul.f32 %v471_v50, %v1341_v2  ;;  %v474_v52 = vstv %s808_s10  ;;  %s814_s5 = sld [smem:[#allocation6 + $0x382]]  ;;  %v457_v6 = vadd.f32 %v456_v54, %v449_v53 }
  0x59   : > { %v475_v55 = vmul.f32 %v474_v52, %v1333_v0  ;;  %v478_v56 = vstv %s809_s13  ;;  %s1396_s7 = sld [smem:[#allocation7 + $0x2]] }
  0x5a   : > { %v479_v58 = vmul.f32 %v1344_v3, %v478_v56  ;;  %v481_v59 = vstv %s810_s4  ;;  %s1399_s11 = sld [smem:[#allocation9 + $0x100]]  ;;  %v460_v19 = vadd.f32 %v459_v11, %v457_v6 }
  0x5b   : > { %v476_v61 = vadd.f32 %v475_v55, %v472_v51  ;;  %v482_v62 = vmul.f32 %v1336_v1, %v481_v59  ;;  %v486_v63 = vstv %s811_s12  ;;  %s1403_s18 = sld [smem:[#allocation9 + $0x101]] }
  0x5c   : > { %v487_v4 = vmul.f32 %v1355_v12, %v486_v63  ;;  %v489_v5 = vstv %s812_s28  ;;  %s818_s19 = sld [smem:[#allocation6 + $0x3]]  ;;  %v461_v35 = vmax.f32 %v460_v19, 0.0 }
  0x5d   : > { %v483_v7 = vadd.f32 %v482_v62, %v479_v58  ;;  %v490_v8 = vmul.f32 %v1359_v14, %v489_v5  ;;  %v494_v9 = vstv %s813_s3  ;;  %s819_s10 = sld [smem:[#allocation6 + $0x203]] }
  0x5e   : > { %v495_v13 = vmul.f32 %v1369_v21, %v494_v9  ;;  %v497_v15 = vstv %s814_s5  ;;  %s820_s30 = sld [smem:[#allocation6 + $0x83]]  ;;  %v467_v48 = vmul.f32 %v466_v36, %v461_v35  ;;  %s779_s5 = sshll.u32 %s1295_s16, 2 }
  0x5f   : > { %v484_v16 = vadd.f32 %v483_v7, %v476_v61  ;;  %v491_v17 = vadd.f32 %v490_v8, %v487_v4  ;;  %v498_v18 = vmul.f32 %v1377_v27, %v497_v15  ;;  %s821_s13 = sld [smem:[#allocation6 + $0x283]]  ;;  %v502_v28 = vstv %s1396_s7  ;;  %s834_s7 = sshll.u32 %s1131_s24, 1 }
  0x60   : > { %s822_s4 = sld [smem:[#allocation6 + $0x103]]  ;;  %v506_v53 = vstv %s1399_s11 }
  0x61   : > { %v492_v20 = vadd.f32 %v491_v17, %v484_v16  ;;  %v499_v22 = vadd.f32 %v498_v18, %v495_v13  ;;  %s823_s12 = sld [smem:[#allocation6 + $0x303]]  ;;  %v509_v54 = vstv %s1403_s18 }
  0x62   : > { %v514_v25 = vstv %s818_s19  ;;  %s824_s20 = sld [smem:[#allocation6 + $0x183]]  ;;  %s615_s19 = scalar_lea.hbm %s1474_s6, %s834_s7 }
  0x63   : > { %v500_v26 = vadd.f32 %v499_v22, %v492_v20  ;;  %v515_v29 = vmul.f32 %v514_v25, %v1341_v2  ;;  %v517_v30 = vstv %s819_s10  ;;  %s825_s28 = sld [smem:[#allocation6 + $0x383]]  ;;  %v423_v2 = vmul.f32 %v422_v24, %v420_v23  ;;  %s363_s10 = scalar_lea.vmem [#allocation12], %s779_s5 }
  0x64   : > { %v518_v33 = vmul.f32 %v517_v30, %v1333_v0  ;;  %v521_v34 = vstv %s820_s30  ;;  %s1418_s3 = sld [smem:[#allocation7 + $0x3]]  ;;  %v426_v0 = vmul.f32 %v425_v31, %v420_v23  ;;  %s616_s24 = sshll.u32 %s363_s10, 4  ;;  %s617_s24 = int_to_ptr.vmem [resolvable:$true] %s616_s24 }
  0x65   : > { %v522_v37 = vmul.f32 %v1344_v3, %v521_v34  ;;  %v524_v38 = vstv %s821_s13  ;;  %v503_v39 = vadd.f32 %v502_v28, %v500_v26  ;;  %s827_s17 = sld [smem:[#allocation9 + $0x180]]  ;;  %v464_v3 = vmul.f32 %v463_v32, %v461_v35  ;;  %s618_s30 = sshll.u32 %s615_s19, 4  ;;  %s619_s30 = int_to_ptr.hbm [resolvable:$true] %s618_s30 }
  0x66   : > { %v519_v40 = vadd.f32 %v518_v33, %v515_v29  ;;  %v525_v41 = vmul.f32 %v1336_v1, %v524_v38  ;;  %v529_v42 = vstv %s822_s4  ;;  %s828_s2 = sld [smem:[#allocation9 + $0x181]]  ;;  %v469_v58 = vadd.f32 %v467_v48, %v426_v0  ;;  %s604_s13 = scalar_lea.sflag [#allocation4], %s1295_s16 }
  0x67   : > { %v530_v43 = vmul.f32 %v1355_v12, %v529_v42  ;;  %v532_v44 = vstv %s823_s12  ;;  %v504_v1 = vmax.f32 %v503_v39, 0.0  ;;  %s556_s9 = sld [smem:[#allocation10]]  ;;  %s1059_s4 = sshra.s32 %s619_s30, 4  ;;  %s1060_s4 = int_to_ptr.hbm [resolvable:$true] %s1059_s4 }
  0x68   : > { %v526_v45 = vadd.f32 %v525_v41, %v522_v37  ;;  %v533_v46 = vmul.f32 %v1359_v14, %v532_v44  ;;  %v537_v47 = vstv %s824_s20  ;;  %v468_v14 = vadd.f32 %v464_v3, %v423_v2  ;;  %s830_s29 = sld [smem:[#allocation10 + $0x1]]  ;;  %s1061_s12 = scalar_lea.hbm %s1060_s4, 4 }
  0x69   : > { %v538_v49 = vmul.f32 %v1369_v21, %v537_v47  ;;  %v540_v50 = vstv %s825_s28  ;;  %v507_v59 = vmul.f32 %v506_v53, %v504_v1  ;;  %v510_v60 = vmul.f32 %v509_v54, %v504_v1  ;;  %p1062_p1 = scmp.ne.s32.totalorder %s1060_s4, %s1061_s12  ;;  %p1066_p12 = scmp.lt.s32.totalorder %s1060_s4, %s1474_s6 }
  0x6a   : > { %v527_v51 = vadd.f32 %v526_v45, %v519_v40  ;;  %v534_v52 = vadd.f32 %v533_v46, %v530_v43  ;;  %v541_v12 = vmul.f32 %v1377_v27, %v540_v50  ;;  %v545_v57 = vstv %s1418_s3  ;;  %s1065_s3 = scalar_lea.hbm %s1474_s6, 8 }
  0x6b   : > { %v549_v62 = vstv %s827_s17  ;;  %v511_v4 = vadd.f32 %v507_v59, %v468_v14  ;;  %v512_v5 = vadd.f32 %v510_v60, %v469_v58  ;;  %p1063_p8 = pnand %p1062_p1, %p1274_p7  ;;  %p1067_p13 = scmp.lt.s32.totalorder %s1065_s3, %s1061_s12 }
  0x6c   : > { %v535_v55 = vadd.f32 %v534_v52, %v527_v51  ;;  %v542_v56 = vadd.f32 %v541_v12, %v538_v49  ;;  %v552_v63 = vstv %s828_s2 }
  0x6d   : > { %v557_v8 = vstv %s556_s9  ;;  %p1064_p11 = pneg %p1063_p8  ;;  %p1068_p0 = por %p1067_p13, %p1066_p12 }
  0x6e   : > { %v543_v61 = vadd.f32 %v542_v56, %v535_v55  ;;  %v580_v9 = vstv %s830_s29 }
  0x6f   : > { %p1069_p3 = pnand %p1068_p0, %p1064_p11 }
  0x70   : > { %v546_v21 = vadd.f32 %v545_v57, %v543_v61 }
  0x72   : > { %v547_v6 = vmax.f32 %v546_v21, 0.0 }
  0x74   : > { %v550_v7 = vmul.f32 %v549_v62, %v547_v6  ;;  %v553_v27 = vmul.f32 %v552_v63, %v547_v6 }
  0x76   : > { %v554_v10 = vadd.f32 %v550_v7, %v511_v4  ;;  %v555_v11 = vadd.f32 %v553_v27, %v512_v5 }
  0x78   : > { %v558_v13 = vadd.f32 %v557_v8, %v554_v10  ;;  %v581_v15 = vadd.f32 %v580_v9, %v555_v11 }
  0x7a   : > { %v829_v16 = vmul.f32 -1.442695, %v558_v13  ;;  %v831_v17 = vmul.f32 -1.442695, %v581_v15 }
  0x7c   : > { %947 = vpow2.f32 %v829_v16 }
  0x7d   : > { %949 = vpow2.f32 %v831_v17 }
  0x82   : > { %v948_v18 = vpop.eup %947 }
  0x83   : > { %v950_v19 = vpop.eup %949  ;;  %v562_v20 = vadd.f32 1.0, %v948_v18 }
  0x84   : > { %v585_v22 = vadd.f32 1.0, %v950_v19 }
  0x85   : > { %951 = vrcp.f32 %v562_v20  ;;  %vm568_vm0 = vweird.f32 %v562_v20  ;;  %v574_v26 = vand.u32 2147483648, %v562_v20  ;;  %v572_v30 = vand.u32 2147483647, %v562_v20 }
  0x86   : > { %953 = vrcp.f32 %v585_v22  ;;  %v597_v31 = vand.u32 2147483648, %v585_v22  ;;  %vm591_vm2 = vweird.f32 %v585_v22  ;;  %v595_v33 = vand.u32 2147483647, %v585_v22 }
  0x87   : > { %v575_v35 = vor.u32 1.1754944e-38, %v574_v26  ;;  %vm573_vm5 = vcmp.eq.f32.partialorder %v572_v30, 8.507059e+37 }
  0x88   : > { %v598_v38 = vor.u32 1.1754944e-38, %v597_v31  ;;  %vm596_vm7 = vcmp.eq.f32.partialorder %v595_v33, 8.507059e+37 }
  0x8b   : > { %v952_v23 = vpop.eup %951 }
  0x8c   : > { %v954_v24 = vpop.eup %953  ;;  %v564_v25 = vmul.f32 %v952_v23, %v562_v20  ;;  %vm569_vm1 = vweird.f32 %v952_v23 }
  0x8d   : > { %v587_v28 = vmul.f32 %v954_v24, %v585_v22  ;;  %vm592_vm3 = vweird.f32 %v954_v24  ;;  %vm570_vm4 = vmor %vm568_vm0, %vm569_vm1 }
  0x8e   : > { %v565_v29 = vsub.f32 1.0, %v564_v25  ;;  %vm593_vm6 = vmor %vm591_vm2, %vm592_vm3 }
  0x8f   : > { %v588_v32 = vsub.f32 1.0, %v587_v28 }
  0x90   : > { %v566_v34 = vmul.f32 %v952_v23, %v565_v29 }
  0x91   : > { %v589_v36 = vmul.f32 %v954_v24, %v588_v32 }
  0x92   : > { %v567_v37 = vadd.f32 %v952_v23, %v566_v34 }
  0x93   : > { %v590_v39 = vadd.f32 %v954_v24, %v589_v36 }
  0x94   : > { %v571_v40 = vsel %vm570_vm4, %v952_v23, %v567_v37 }
  0x95   : > { %v576_v41 = vsel %vm573_vm5, %v575_v35, %v571_v40  ;;  %v594_v42 = vsel %vm593_vm6, %v954_v24, %v590_v39 }
  0x96   : > { %578 = vst [vmem:[%s363_s10] sm:$0x3] %v576_v41  ;;  %v599_v2 = vsel %vm596_vm7, %v598_v38, %v594_v42 }
  0x97   : > { %832 = vst [vmem:[%s363_s10 + $0x2] sm:$0x3] %v599_v2 }
  0x98   : > { %1072 = shalt.err (!%p1069_p3)
}
  0x99   : > { %s1147_s16 = smov 32   ;;  %s1148_s9 = smov 64  }
  0x9a   : > { %s1149_s29 = smov 2  }
  0x9b   : > { %857 = dma.vmem_to_hbm [thread:$0]  (%p1274_p7), %s617_s24, 64, %s619_s30, %s604_s13, %s1147_s16, %s1148_s9, %s1149_s29  }
  0x9c PF: > { %s633_s5 = sand.u32 1, %s1119_s21   ;;  %p877_p5 = pnand %p769_p9, %p1234_p6 }
  0x9d   : > { %s634_s7 = scalar_lea.sflag [#allocation4], %s633_s5 }
  0x9e   : > { %p878_p10 = pneg %p877_p5 }
  0xa0   : > { %1114 = dma.done.wait (%p878_p10), %s634_s7, 64  }
  0xa1   : > { %1116 = vsyncadd (%p878_p10), %s634_s7, 4294967232  ;;  %s25_s26 = sadd.s32 1, %s1139_s26   ;;  %s1490_s21 = smov %s1123_s22 }
  0xa2   : > { %p22_p2 = scmp.ge.s32.totalorder %s25_s26, 4   ;;  %s1491_s22 = smov %s1127_s23 }
  0xa3   : > { %s1492_s23 = smov %s1283_s27  ;;  %s1493_s24 = smov %s1135_s25 }
  0xa4   : > { %s1494_s25 = smov %s1496_s14  ;;  %24 = sbr.rel (!%p22_p2) target bundleno = 14 (0xe), region = 116 }
  0xa9   :  { %640 = vsyncpa [#allocation3], 1 }
  0xaa   :  { %642 = vsyncpa [#allocation3 + $0x1], 1 }
  0xab   :  { %643 = vsyncpa [#allocation4], 1 }
  0xac   :  { %645 = vsyncpa [#allocation4 + $0x1], 1 }
  0xad   :  { %646 = vsyncpa [#allocation5], 1 }
  0xae   :  { %648 = vsyncpa [#allocation5 + $0x1], 1 }
  0xaf   :  { %649 = vsyncpa [#allocation8], 1 }
  0xb0   :  { %650 = vsyncpa [#allocation11], 1 }

</bundles_post_ra>
